<compile_context>
chip_gen: v5e
topology: v5e:2x2
jax: 0.10.0
libtpu: 0.0.40
codegen_flags: <defaults>
</compile_context>

<pallas_src>
import jax
import jax.numpy as jnp
from jax import lax
from jax.experimental import pallas as pl
from jax.experimental.pallas import tpu as pltpu


def _short_conv_kernel(x_ref, w_ref, b_ref, o_ref, tail_ref):
    # x_ref:    (tL, tD)  current L-tile of one (batch, D-tile), native dtype
    # w_ref:    (K, tD)   depthwise taps (tap index on sublanes, channels on lanes)
    # b_ref:    (1, tD)   bias slice
    # o_ref:    (tL, tD)
    # tail_ref: (H, tD)   scratch: last H rows of the previous L-tile (causal halo)
    l = pl.program_id(2)
    K = w_ref.shape[0]
    H = tail_ref.shape[0]
    tL = x_ref.shape[0]

    @pl.when(l == 0)
    def _():
        tail_ref[...] = jnp.zeros_like(tail_ref)

    x = x_ref[...]                                     # (tL, tD), native dtype
    ws = [w_ref[j].astype(jnp.float32)[None, :] for j in range(K)]
    b_row = b_ref[0].astype(jnp.float32)[None, :]      # (1, tD)

    # ---- bulk: within-tile taps only.  Rows t < K-1 of `acc` use wrapped values
    #      (garbage) and are overwritten by the head fix-up below. ----
    acc = x.astype(jnp.float32) * ws[K - 1] + b_row    # tap j = K-1 (shift 0) + bias
    for j in range(K - 1):
        s = K - 1 - j                                  # causal shift for tap j
        acc = acc + pltpu.roll(x, s, axis=0).astype(jnp.float32) * ws[j]

    # ---- head: recompute the first H rows correctly from the carried halo ----
    xh = x[:H]                                         # (H, tD)
    buf = jnp.concatenate([tail_ref[...], xh], axis=0)  # (2H, tD): [prev tail | head]
    head = xh.astype(jnp.float32) * ws[K - 1] + b_row
    for j in range(K - 1):
        s = K - 1 - j
        head = head + buf[H - s:2 * H - s].astype(jnp.float32) * ws[j]

    # ---- carry the last H rows for the next L-tile, then store ----
    tail_ref[...] = x[tL - H:]
    o_ref[...] = acc.astype(o_ref.dtype)
    o_ref[pl.ds(0, H), :] = head.astype(o_ref.dtype)


def _round_up(n, m):
    return ((n + m - 1) // m) * m


def _cdiv(a, b):
    return (a + b - 1) // b


def short_convolution(x, weight, bias):
    """Causal depthwise conv, dimension-last.

    x:      (B, L, D)
    weight: (K, D)   == torch conv.weight[:, 0, :].T (tap index first, channel last)
    bias:   (D,)
    returns (B, L, D)
    """
    B, L, D = x.shape
    K = weight.shape[0]
    itemsize = jnp.dtype(x.dtype).itemsize
    sub = {4: 8, 2: 16, 1: 32}.get(itemsize, 8)        # dtype-aware sublane packing

    # ---- lane-dense channel padding (multiple of 128) and channel tile ----
    D_pad = _round_up(D, 128)
    if D_pad <= 512:
        tD = D_pad
    elif D_pad % 512 == 0:
        tD = 512
    elif D_pad % 256 == 0:
        tD = 256
    else:
        tD = 128

    # Guarantee >= 2 blocks along the parallel axes when possible (v7x: 2 TCs/chip).
    if B == 1 and (D_pad // tD) < 2 and D_pad >= 256:
        nb = D_pad // 128
        for nblk in range(2, nb + 1):
            if nb % nblk == 0:
                tD = (nb // nblk) * 128
                break

    # ---- halo rows: one packed-sublane block, >= K-1 ----
    H = max(sub, _round_up(max(K - 1, 1), sub))

    # ---- sequence tile: ~2 MiB blocks, balanced so padding is avoided when L is
    #      already sublane-aligned ----
    cap_rows = max(H, (2 * 1024 * 1024) // (tD * itemsize))
    cap_rows = max(sub, (cap_rows // sub) * sub)
    cap_rows = max(cap_rows, H)
    n_l = _cdiv(L, cap_rows)
    tL = max(H, _round_up(_cdiv(L, n_l), sub))
    L_pad = n_l * tL

    # Padding is a no-op (no extra HBM traffic) for already-aligned shapes.
    if D_pad != D or L_pad != L:
        x = jnp.pad(x, ((0, 0), (0, L_pad - L), (0, D_pad - D)))
    if D_pad != D:
        weight = jnp.pad(weight, ((0, 0), (0, D_pad - D)))
        bias = jnp.pad(bias, ((0, D_pad - D),))
    bias2d = bias.reshape(1, D_pad)

    grid = (B, D_pad // tD, n_l)

    y = pl.pallas_call(
        _short_conv_kernel,
        out_shape=jax.ShapeDtypeStruct((B, L_pad, D_pad), x.dtype),
        grid_spec=pltpu.PrefetchScalarGridSpec(
            num_scalar_prefetch=0,
            grid=grid,
            in_specs=[
                pl.BlockSpec((None, tL, tD), lambda b, d, l: (b, l, d)),
                pl.BlockSpec((K, tD), lambda b, d, l: (0, d)),   # invariant along b, l
                pl.BlockSpec((1, tD), lambda b, d, l: (0, d)),   # invariant along b, l
            ],
            out_specs=pl.BlockSpec((None, tL, tD), lambda b, d, l: (b, l, d)),
            scratch_shapes=[pltpu.VMEM((H, tD), x.dtype)],
        ),
        compiler_params=pltpu.CompilerParams(
            dimension_semantics=("parallel", "parallel", "arbitrary"),
            vmem_limit_bytes=48 * 1024 * 1024,
        ),
    )(x, weight, bias2d)

    if D_pad != D or L_pad != L:
        y = y[:, :L, :D]
    return y


def short_convolution_ref(x, weight, bias):
    """Pure-JAX reference identical to the PyTorch forward."""
    B, L, D = x.shape
    K = weight.shape[0]
    w_oiw = jnp.transpose(weight, (1, 0))[:, None, :]        # (D, 1, K)
    y = lax.conv_general_dilated(
        jnp.transpose(x, (0, 2, 1)),                          # (B, D, L)
        w_oiw,
        window_strides=(1,),
        padding=[(K - 1, K - 1)],
        feature_group_count=D,
        dimension_numbers=("NCH", "OIH", "NCH"),
    )
    y = y[..., :L] + bias[None, :, None]
    return jnp.transpose(y, (0, 2, 1))                        # (B, L, D)


if __name__ == "__main__":
    B, L, D, K = 2, 16, 32, 4

    key = jax.random.PRNGKey(0)
    kx, kw, kb = jax.random.split(key, 3)

    x = jax.random.normal(kx, (B, L, D), dtype=jnp.float32)

    # PyTorch nn.Conv1d default init: U(-sqrt(k), sqrt(k)), k = 1/(in/groups * K) = 1/K
    bound = 1.0 / (K ** 0.5)
    weight = jax.random.uniform(kw, (K, D), jnp.float32, -bound, bound)
    bias = jax.random.uniform(kb, (D,), jnp.float32, -bound, bound)

    y = jax.block_until_ready(short_convolution(x, weight, bias))
    y_ref = short_convolution_ref(x, weight, bias)
    assert y.shape == (B, L, D)
    assert jnp.allclose(y, y_ref, rtol=1e-5, atol=1e-5), "mismatch vs reference"

    # Multi-tile sanity check: cross-L-tile halo carry, ragged (non-tile-aligned)
    # sequence length, channel padding, and the forced channel split for B == 1.
    B2, L2, D2 = 1, 4100, 160
    x2 = jax.random.normal(jax.random.PRNGKey(1), (B2, L2, D2), dtype=jnp.float32)
    w2 = jax.random.uniform(jax.random.PRNGKey(2), (K, D2), jnp.float32, -bound, bound)
    b2 = jax.random.uniform(jax.random.PRNGKey(3), (D2,), jnp.float32, -bound, bound)
    y2 = jax.block_until_ready(short_convolution(x2, w2, b2))
    y2_ref = short_convolution_ref(x2, w2, b2)
    assert jnp.allclose(y2, y2_ref, rtol=1e-5, atol=1e-5), "multi-tile mismatch"

    print("KERNEL_OK")
</pallas_src>

<mosaic_0001>
module attributes {stable_mosaic.version = 11 : i64} {
  func.func @_short_conv_kernel(%arg0: i32, %arg1: i32, %arg2: i32, %arg3: memref<1x16x128xf32, #tpu.memory_space<vmem>>, %arg4: memref<4x128xf32, #tpu.memory_space<vmem>>, %arg5: memref<1x128xf32, #tpu.memory_space<vmem>>, %arg6: memref<1x16x128xf32, #tpu.memory_space<vmem>>, %arg7: memref<8x128xf32, #tpu.memory_space<vmem>>) attributes {dimension_semantics = [#tpu.dimension_semantics<parallel>, #tpu.dimension_semantics<parallel>, #tpu.dimension_semantics<arbitrary>], iteration_bounds = array<i64: 2, 1, 1>, scalar_prefetch = 0 : i64, scratch_operands = 1 : i64, tpu.core_type = #tpu.core_type<tc>, window_params = [{transform_indices = @transform_0, window_bounds = array<i64: 1, 16, 128>}, {transform_indices = @transform_1, window_bounds = array<i64: 4, 128>}, {transform_indices = @transform_2, window_bounds = array<i64: 1, 128>}, {transform_indices = @transform_3, window_bounds = array<i64: 1, 16, 128>}]} {
    %c0_i32 = arith.constant 0 : i32
    %0 = arith.cmpi eq, %arg2, %c0_i32 : i32
    %1 = arith.extui %0 : i1 to i32
    %c0_i32_0 = arith.constant 0 : i32
    %2 = arith.cmpi ne, %1, %c0_i32_0 : i32
    scf.if %2 {
      %cst = arith.constant 0.000000e+00 : f32
      %63 = vector.broadcast %cst : f32 to vector<8x128xf32>
      %c0_20 = arith.constant 0 : index
      %c0_21 = arith.constant 0 : index
      %64 = vector.load %arg7[%c0_20, %c0_21] : memref<8x128xf32, #tpu.memory_space<vmem>>, vector<8x128xf32>
      tpu.vector_store %arg7[%c0_20, %c0_21], %63 {strides = array<i32>} : memref<8x128xf32, #tpu.memory_space<vmem>>, vector<8x128xf32>,
    } else {
    }
    %c0 = arith.constant 0 : index
    %c0_1 = arith.constant 0 : index
    %c0_2 = arith.constant 0 : index
    %3 = vector.load %arg3[%c0, %c0_1, %c0_2] : memref<1x16x128xf32, #tpu.memory_space<vmem>>, vector<1x16x128xf32>
    %4 = vector.shape_cast %3 : vector<1x16x128xf32> to vector<16x128xf32>
    %c0_3 = arith.constant 0 : index
    %c0_4 = arith.constant 0 : index
    %5 = vector.load %arg4[%c0_3, %c0_4] : memref<4x128xf32, #tpu.memory_space<vmem>>, vector<1x128xf32>
    %6 = vector.shape_cast %5 : vector<1x128xf32> to vector<128xf32>
    %7 = vector.shape_cast %6 : vector<128xf32> to vector<1x128xf32>
    %c1 = arith.constant 1 : index
    %c0_5 = arith.constant 0 : index
    %8 = vector.load %arg4[%c1, %c0_5] : memref<4x128xf32, #tpu.memory_space<vmem>>, vector<1x128xf32>
    %9 = vector.shape_cast %8 : vector<1x128xf32> to vector<128xf32>
    %10 = vector.shape_cast %9 : vector<128xf32> to vector<1x128xf32>
    %c2 = arith.constant 2 : index
    %c0_6 = arith.constant 0 : index
    %11 = vector.load %arg4[%c2, %c0_6] : memref<4x128xf32, #tpu.memory_space<vmem>>, vector<1x128xf32>
    %12 = vector.shape_cast %11 : vector<1x128xf32> to vector<128xf32>
    %13 = vector.shape_cast %12 : vector<128xf32> to vector<1x128xf32>
    %c3 = arith.constant 3 : index
    %c0_7 = arith.constant 0 : index
    %14 = vector.load %arg4[%c3, %c0_7] : memref<4x128xf32, #tpu.memory_space<vmem>>, vector<1x128xf32>
    %15 = vector.shape_cast %14 : vector<1x128xf32> to vector<128xf32>
    %16 = vector.shape_cast %15 : vector<128xf32> to vector<1x128xf32>
    %c0_8 = arith.constant 0 : index
    %c0_9 = arith.constant 0 : index
    %17 = vector.load %arg5[%c0_8, %c0_9] : memref<1x128xf32, #tpu.memory_space<vmem>>, vector<1x128xf32>
    %18 = vector.shape_cast %17 : vector<1x128xf32> to vector<128xf32>
    %19 = vector.shape_cast %18 : vector<128xf32> to vector<1x128xf32>
    %20 = vector.broadcast %16 : vector<1x128xf32> to vector<16x128xf32>
    %21 = arith.mulf %4, %20 : vector<16x128xf32>
    %22 = vector.broadcast %19 : vector<1x128xf32> to vector<16x128xf32>
    %23 = arith.addf %21, %22 : vector<16x128xf32>
    %c3_i32 = arith.constant 3 : i32
    %24 = tpu.dynamic_rotate %4 by %c3_i32 dim 0 : vector<16x128xf32>, i32 -> vector<16x128xf32>
    %25 = vector.broadcast %7 : vector<1x128xf32> to vector<16x128xf32>
    %26 = arith.mulf %24, %25 : vector<16x128xf32>
    %27 = arith.addf %23, %26 : vector<16x128xf32>
    %c2_i32 = arith.constant 2 : i32
    %28 = tpu.dynamic_rotate %4 by %c2_i32 dim 0 : vector<16x128xf32>, i32 -> vector<16x128xf32>
    %29 = vector.broadcast %10 : vector<1x128xf32> to vector<16x128xf32>
    %30 = arith.mulf %28, %29 : vector<16x128xf32>
    %31 = arith.addf %27, %30 : vector<16x128xf32>
    %c1_i32 = arith.constant 1 : i32
    %32 = tpu.dynamic_rotate %4 by %c1_i32 dim 0 : vector<16x128xf32>, i32 -> vector<16x128xf32>
    %33 = vector.broadcast %13 : vector<1x128xf32> to vector<16x128xf32>
    %34 = arith.mulf %32, %33 : vector<16x128xf32>
    %35 = arith.addf %31, %34 : vector<16x128xf32>
    %36 = vector.extract_strided_slice %4 {offsets = [0, 0], sizes = [8, 128], strides = [1, 1]} : vector<16x128xf32> to vector<8x128xf32>
    %c0_10 = arith.constant 0 : index
    %c0_11 = arith.constant 0 : index
    %37 = vector.load %arg7[%c0_10, %c0_11] : memref<8x128xf32, #tpu.memory_space<vmem>>, vector<8x128xf32>
    %38 = tpu.concatenate %37, %36 in 0 : vector<8x128xf32>, vector<8x128xf32> -> vector<16x128xf32>
    %39 = vector.broadcast %16 : vector<1x128xf32> to vector<8x128xf32>
    %40 = arith.mulf %36, %39 : vector<8x128xf32>
    %41 = vector.broadcast %19 : vector<1x128xf32> to vector<8x128xf32>
    %42 = arith.addf %40, %41 : vector<8x128xf32>
    %43 = vector.extract_strided_slice %38 {offsets = [5, 0], sizes = [8, 128], strides = [1, 1]} : vector<16x128xf32> to vector<8x128xf32>
    %44 = vector.broadcast %7 : vector<1x128xf32> to vector<8x128xf32>
    %45 = arith.mulf %43, %44 : vector<8x128xf32>
    %46 = arith.addf %42, %45 : vector<8x128xf32>
    %47 = vector.extract_strided_slice %38 {offsets = [6, 0], sizes = [8, 128], strides = [1, 1]} : vector<16x128xf32> to vector<8x128xf32>
    %48 = vector.broadcast %10 : vector<1x128xf32> to vector<8x128xf32>
    %49 = arith.mulf %47, %48 : vector<8x128xf32>
    %50 = arith.addf %46, %49 : vector<8x128xf32>
    %51 = vector.extract_strided_slice %38 {offsets = [7, 0], sizes = [8, 128], strides = [1, 1]} : vector<16x128xf32> to vector<8x128xf32>
    %52 = vector.broadcast %13 : vector<1x128xf32> to vector<8x128xf32>
    %53 = arith.mulf %51, %52 : vector<8x128xf32>
    %54 = arith.addf %50, %53 : vector<8x128xf32>
    %55 = vector.extract_strided_slice %4 {offsets = [8, 0], sizes = [8, 128], strides = [1, 1]} : vector<16x128xf32> to vector<8x128xf32>
    %c0_12 = arith.constant 0 : index
    %c0_13 = arith.constant 0 : index
    %56 = vector.load %arg7[%c0_12, %c0_13] : memref<8x128xf32, #tpu.memory_space<vmem>>, vector<8x128xf32>
    tpu.vector_store %arg7[%c0_12, %c0_13], %55 {strides = array<i32>} : memref<8x128xf32, #tpu.memory_space<vmem>>, vector<8x128xf32>,
    %c0_14 = arith.constant 0 : index
    %c0_15 = arith.constant 0 : index
    %c0_16 = arith.constant 0 : index
    %57 = vector.load %arg6[%c0_14, %c0_15, %c0_16] : memref<1x16x128xf32, #tpu.memory_space<vmem>>, vector<1x16x128xf32>
    %58 = vector.shape_cast %57 : vector<1x16x128xf32> to vector<16x128xf32>
    %59 = vector.shape_cast %35 : vector<16x128xf32> to vector<1x16x128xf32>
    tpu.vector_store %arg6[%c0_14, %c0_15, %c0_16], %59 {strides = array<i32>} : memref<1x16x128xf32, #tpu.memory_space<vmem>>, vector<1x16x128xf32>,
    %c0_17 = arith.constant 0 : index
    %c0_18 = arith.constant 0 : index
    %c0_19 = arith.constant 0 : index
    %60 = vector.load %arg6[%c0_17, %c0_18, %c0_19] : memref<1x16x128xf32, #tpu.memory_space<vmem>>, vector<1x8x128xf32>
    %61 = vector.shape_cast %60 : vector<1x8x128xf32> to vector<8x128xf32>
    %62 = vector.shape_cast %54 : vector<8x128xf32> to vector<1x8x128xf32>
    tpu.vector_store %arg6[%c0_17, %c0_18, %c0_19], %62 {strides = array<i32>} : memref<1x16x128xf32, #tpu.memory_space<vmem>>, vector<1x8x128xf32>,
    return
  }
  func.func @transform_0(%arg0: i32, %arg1: i32, %arg2: i32) -> (i32, i32, i32) {
    %c0_i32 = arith.constant 0 : i32
    return %arg0, %arg2, %arg1 : i32, i32, i32
  }
  func.func @transform_1(%arg0: i32, %arg1: i32, %arg2: i32) -> (i32, i32) {
    %c0_i32 = arith.constant 0 : i32
    %c0_i32_0 = arith.constant 0 : i32
    return %c0_i32, %arg1 : i32, i32
  }
  func.func @transform_2(%arg0: i32, %arg1: i32, %arg2: i32) -> (i32, i32) {
    %c0_i32 = arith.constant 0 : i32
    %c0_i32_0 = arith.constant 0 : i32
    return %c0_i32, %arg1 : i32, i32
  }
  func.func @transform_3(%arg0: i32, %arg1: i32, %arg2: i32) -> (i32, i32, i32) {
    %c0_i32 = arith.constant 0 : i32
    return %arg0, %arg2, %arg1 : i32, i32, i32
  }
}

</mosaic_0001>

<bundles_post_ra>
// kernel: tpu_custom_call.1
= control target key start
LH: loop header
LB: loop body
LE: loop exit
PB: predicated region body
PF: predicated region fallthrough
CT: control target
= control target key end

     0   :  { %s919_s0 = inlined_call_operand.hbm [shape: f32[2,16,128], index: 0, kind: input, shape index: {}]   ;;  %s920_s1 = inlined_call_operand.hbm [shape: f32[4,128], index: 1, kind: input, shape index: {}]   ;;  %s921_s2 = inlined_call_operand.vmem [shape: f32[1,128], index: 2, kind: input, shape index: {}]   ;;  %s922_s3 = inlined_call_operand.hbm [shape: f32[2,16,128], index: 3, kind: output, shape index: {}]  }
   0x1   :  { %923 = sst [smem:[#allocation12_spill]] %s920_s1 }
   0x2   :  { %8 = vsyncpa [#allocation4], 0 }
   0x3   :  { %10 = vsyncpa [#allocation4 + $0x1], 0 }
   0x4   :  { %11 = vsyncpa [#allocation7], 0 }
   0x5   :  { %12 = vsyncpa [#allocation5], 0 }
   0x6   :  { %14 = vsyncpa [#allocation5 + $0x1], 0  ;;  %s756_s12 = smov 0   ;;  %s758_s13 = smov 0  }
   0x7   :  { %s760_s14 = smov 0   ;;  %s762_s15 = smov 0  }
   0x8   :  { %s764_s16 = smov 0   ;;  %s766_s17 = smov 0  }
   0x9 LB: > { %s481_s18 = sadd.s32 4294967295, %s729_s17   ;;  %s482_s19 = sadd.s32 4294967294, %s729_s17   ;;  %s729_s17 = sphi %s766_s17, %s20_s17   ;;  %s725_s16 = sphi %s764_s16, %s936_s16   ;;  %s721_s15 = sphi %s762_s15, %s935_s15   ;;  %s717_s14 = sphi %s760_s14, %s934_s14   ;;  %s713_s13 = sphi %s758_s13, %s933_s13   ;;  %s709_s12 = sphi %s756_s12, %s932_s12  }
   0xa   : > { %s50_s20 = sadd.s32 1, %s717_s14  ;;  %p57_p0 = scmp.ne.s32.totalorder %s717_s14, %s713_s13 }
   0xb   : > { %p58_p1 = scmp.eq.s32.totalorder %s729_s17, 0  ;;  %p63_p2 = scmp.ne.s32.totalorder %s713_s13, %s709_s12 }
   0xc   : > { %p794_p3 = scmp.eq.s32.totalorder %s481_s18, 0  ;;  %p143_p4 = scmp.eq.s32.totalorder %s481_s18, 1 }
   0xd   : > { %p798_p5 = por %p58_p1, %p57_p0  ;;  %p149_p6 = scmp.eq.s32.totalorder %s482_s19, 1 }
   0xe   : > { %p804_p7 = por %p794_p3, %p63_p2  ;;  %p808_p8 = por %p143_p4, %p57_p0 }
   0xf   : > { %p812_p9 = por %p149_p6, %p63_p2  ;;  %p483_p10 = scmp.ge.s32.totalorder %s729_s17, 1 }
  0x10   : > { %p156_p11 = scmp.lt.s32.totalorder %s729_s17, 3  ;;  %s929_s1 = sld [smem:[#allocation12_spill]] }
  0x11   : > { %s731_s30 = smov [#allocation6]   ;;  %p486_p13 = scmp.ge.s32.totalorder %s729_s17, 2 }
  0x12   : > { %p821_p12 = pnand %p483_p10, %p156_p11  ;;  %s172_s4 = sshll.u32 %s731_s30, 4  ;;  %s173_s4 = int_to_ptr.vmem [resolvable:$true] %s172_s4 }
  0x13   : > { %p522_p1 = scmp.lt.s32.totalorder %s729_s17, 2  ;;  %s39_s6 = sadd.s32 1, %s725_s16 }
  0x14   : > { %p509_p0 = pneg %p821_p12  ;;  %p41_p6 = scmp.ge.s32.totalorder %s39_s6, 2 }
  0x15   : > { %p833_p4 = pnand %p522_p1, %p798_p5  ;;  %s189_s7 = sand.u32 1, %s717_s14  }
  0x16   : > { %s170_s28 = sshll.u32 %s929_s1, 4  ;;  %p510_p2 = pnand %p509_p0, %p794_p3  ;;  %s171_s28 = int_to_ptr.hbm [resolvable:$true] %s170_s28 }
  0x17   : > { %s938_s6 = smov (%p41_p6, %s39_s6), 0  ;;  %s487_s8 = sshll.u32 %s189_s7, 4 }
  0x18   : > { %512 = dma.hbm_to_vmem [thread:$0]  (!%p510_p2), %s171_s28, 64, %s173_s4, [#allocation7]  }
  0x19   : > { %s43_s9 = ssub.s32 %s725_s16, %s938_s6  ;;  %s499_s10 = sshll.u32 %s725_s16, 4 }
  0x1a   : > { %p48_p10 = scmp.eq.s32.totalorder %s43_s9, 0  ;;  %s201_s19 = scalar_lea.hbm %s919_s0, %s499_s10 }
  0x1b   : > { %s193_s22 = scalar_lea.vmem [#allocation3], %s487_s8  ;;  %s202_s30 = sshll.u32 %s201_s19, 4  ;;  %s203_s30 = int_to_ptr.hbm [resolvable:$true] %s202_s30 }
  0x1c   : > { %s204_s26 = sshll.u32 %s193_s22, 4  ;;  %s190_s28 = scalar_lea.sflag [#allocation4], %s189_s7  ;;  %s205_s26 = int_to_ptr.vmem [resolvable:$true] %s204_s26 }
  0x1d   : > { %s850_s27 = scalar_select %p48_p10, %s717_s14, %s50_s20  }
  0x1e   : > { %s732_s4 = smov 128   ;;  %s733_s1 = smov 8  }
  0x1f   : > { %516 = dma.hbm_to_vmem [thread:$0]  (!%p833_p4), %s203_s30, 256, %s205_s26, %s190_s28, %s732_s4, %s732_s4, %s733_s1  }
  0x20   : > { %216 = sbr.rel (%p821_p12) target bundleno = 60 (0x3c), region = 32  ;;  %s857_s9 = sand.u32 (!%p821_p12), 1, %s713_s13  }
  0x21   : > { %s491_s20 = sshll.u32 (!%p821_p12), %s857_s9, 4  ;;  %s219_s8 = scalar_lea.sflag (!%p821_p12), [#allocation4], %s857_s9 }
  0x22   : > { %s222_s10 = scalar_lea.vmem (!%p821_p12), [#allocation3], %s491_s20 }
  0x25   : > { %696 = dma.done.wait (%p804_p7), %s219_s8, 256  }
  0x26   : > { %698 = vsyncadd (%p804_p7), %s219_s8, 4294967040 }
  0x27   : > { %700 = dma.done.wait (%p794_p3), [#allocation7], 64  }
  0x28   : > { %702 = vsyncadd (%p794_p3), [#allocation7], 4294967232  ;;  %v281_v0 = vlaneseq  ;;  %vm316_vm1 = vcmask 1042432   ;;  %v264_v2 = vld [vmem:[%s222_s10] sm:$0xff]  ;;  %v265_v3 = vld [vmem:[%s222_s10 + $0x8] sm:$0xff]  ;;  %vm326_vm4 = vcmask 1041408  }
  0x29   : > { %v578_v4 = vld [vmem:[#allocation6 + $0x3] ss:$0 sm:$0xff]  ;;  %v579_v5 = vld [vmem:[%s921_s2] ss:$0 sm:$0xff]  ;;  %v279_v6 = vrot.slane %v264_v2, 5  ;;  %v280_v7 = vrot.slane %v265_v3, 5 }
  0x2a   : > { %v282_v1 = vshrl.u32 %v281_v0, 7  ;;  %v580_v8 = vld [vmem:[#allocation6] ss:$0 sm:$0xff]  ;;  %v291_v9 = vrot.slane %v264_v2, 6  ;;  %v292_v10 = vrot.slane %v265_v3, 6  ;;  %v272_v11 = vmul.f32 %v578_v4, %v264_v2  ;;  %s500_s21 = sshll.u32 %s721_s15, 4 }
  0x2b   : > { %v581_v12 = vld [vmem:[#allocation6 + $0x1] ss:$0 sm:$0xff]  ;;  %v301_v13 = vrot.slane %v264_v2, 7  ;;  %v302_v14 = vrot.slane %v265_v3, 7  ;;  %v582_v15 = vld [vmem:[#allocation6 + $0x2] ss:$0 sm:$0xff]  ;;  %v273_v16 = vmul.f32 %v578_v4, %v265_v3  ;;  %v313_v20 = vmul.f32 %v580_v8, %v264_v2  ;;  %s361_s7 = scalar_lea.hbm %s922_s3, %s500_s21 }
  0x2c   : > { %vm283_vm0 = vcmp.lt.s32.totalorder %v282_v1, 3  ;;  %vm293_vm2 = vcmp.lt.s32.totalorder %v282_v1, 2  ;;  %vm303_vm3 = vcmp.lt.s32.totalorder %v282_v1, 1  ;;  %v312_v19 = vmul.f32 0.0, %v580_v8  ;;  %s253_s15 = scalar_lea.vmem [#allocation8], %s491_s20  ;;  %s364_s18 = sshll.u32 %s361_s7, 4  ;;  %s365_s18 = int_to_ptr.hbm [resolvable:$true] %s364_s18 }
  0x2d   : > { %v284_v17 = vsel %vm283_vm0, %v279_v6, %v280_v7  ;;  %v294_v18 = vsel %vm293_vm2, %v291_v9, %v292_v10  ;;  %v277_v21 = vadd.f32 %v579_v5, %v272_v11  ;;  %v278_v22 = vadd.f32 %v579_v5, %v273_v16  ;;  %s362_s11 = sshll.u32 %s253_s15, 4  ;;  %s347_s19 = scalar_lea.sflag [#allocation5], %s857_s9  ;;  %s363_s11 = int_to_ptr.vmem [resolvable:$true] %s362_s11 }
  0x2e   : > { %v288_v23 = vmul.f32 %v580_v8, %v284_v17  ;;  %v298_v24 = vmul.f32 %v581_v12, %v294_v18  ;;  %v304_v25 = vsel %vm303_vm3, %v301_v13, %v302_v14  ;;  %v317_v26 = vrot.slane %v312_v19, 5  ;;  %s657_s22 = sshra.s32 %s365_s18, 4  ;;  %s663_s4 = scalar_lea.hbm %s922_s3, 32  ;;  %s658_s22 = int_to_ptr.hbm [resolvable:$true] %s657_s22 }
  0x2f   : > { %v318_v27 = vrot.slane %v313_v20, 5  ;;  %v322_v28 = vmul.f32 0.0, %v581_v12  ;;  %v308_v30 = vmul.f32 %v582_v15, %v304_v25  ;;  %v323_v31 = vmul.f32 %v581_v12, %v264_v2  ;;  %s659_s26 = scalar_lea.hbm %s658_s22, 16  ;;  %p664_p11 = scmp.lt.s32.totalorder %s658_s22, %s922_s3 }
  0x30   : > { %v290_v29 = vadd.f32 %v288_v23, %v278_v22  ;;  %v332_v32 = vmul.f32 0.0, %v582_v15  ;;  %v333_v35 = vmul.f32 %v582_v15, %v264_v2  ;;  %vm336_vm5 = vcmask 1040384   ;;  %p660_p3 = scmp.ne.s32.totalorder %s658_s22, %s659_s26  ;;  %p665_p12 = scmp.lt.s32.totalorder %s663_s4, %s659_s26 }
  0x31   : > { %v319_v33 = vsel %vm316_vm1, %v317_v26, %v318_v27  ;;  %v327_v34 = vrot.slane %v322_v28, 6  ;;  %v328_v38 = vrot.slane %v323_v31, 6 }
  0x32   : > { %v300_v36 = vadd.f32 %v298_v24, %v290_v29  ;;  %v321_v37 = vadd.f32 %v319_v33, %v277_v21  ;;  %v337_v39 = vrot.slane %v332_v32, 7  ;;  %v338_v40 = vrot.slane %v333_v35, 7  ;;  %p661_p5 = pnand %p660_p3, %p808_p8  ;;  %p666_p0 = por %p665_p12, %p664_p11 }
  0x33   : > { %v329_v42 = vsel %vm326_vm4, %v327_v34, %v328_v38 }
  0x34   : > { %v310_v41 = vadd.f32 %v308_v30, %v300_v36  ;;  %v331_v43 = vadd.f32 %v329_v42, %v321_v37  ;;  %v339_v44 = vsel %vm336_vm5, %v337_v39, %v338_v40  ;;  %p662_p7 = pneg %p661_p5 }
  0x36   : > { %344 = vst [vmem:[%s253_s15 + $0x8] sm:$0xff] %v310_v41  ;;  %v341_v45 = vadd.f32 %v339_v44, %v331_v43  ;;  %p667_p1 = pnand %p666_p0, %p662_p7 }
  0x38   : > { %345 = vst [vmem:[%s253_s15] sm:$0xff] %v341_v45 }
  0x39   : > { %670 = shalt.err (!%p667_p1)
}
  0x3a   : > { %s734_s9 = smov 128   ;;  %s735_s10 = smov 8  }
  0x3b   : > { %507 = dma.vmem_to_hbm [thread:$0]  (%p808_p8), %s363_s11, 256, %s365_s18, %s347_s19, %s734_s9, %s734_s9, %s735_s10  }
  0x3c PF: > { %s379_s1 = sand.u32 1, %s709_s12   ;;  %p518_p2 = pnand %p486_p13, %p812_p9 }
  0x3d   : > { %s380_s29 = scalar_lea.sflag [#allocation5], %s379_s1 }
  0x3e   : > { %p519_p4 = pneg %p518_p2 }
  0x40   : > { %704 = dma.done.wait (%p519_p4), %s380_s29, 256  }
  0x41   : > { %706 = vsyncadd (%p519_p4), %s380_s29, 4294967040  ;;  %s20_s17 = sadd.s32 1, %s729_s17   ;;  %s932_s12 = smov %s713_s13 }
  0x42   : > { %p17_p6 = scmp.ge.s32.totalorder %s20_s17, 4   ;;  %s933_s13 = smov %s717_s14 }
  0x43   : > { %s934_s14 = smov %s850_s27  ;;  %s935_s15 = smov %s725_s16 }
  0x44   : > { %s936_s16 = smov %s938_s6  ;;  %19 = sbr.rel (!%p17_p6) target bundleno = 9 (0x9), region = 89 }
  0x49   :  { %386 = vsyncpa [#allocation4], 1 }
  0x4a   :  { %388 = vsyncpa [#allocation4 + $0x1], 1 }
  0x4b   :  { %389 = vsyncpa [#allocation7], 1 }
  0x4c   :  { %390 = vsyncpa [#allocation5], 1 }
  0x4d   :  { %392 = vsyncpa [#allocation5 + $0x1], 1 }

</bundles_post_ra>
